<compile_context>
chip_gen: v6e
topology: v6e:2x2x1
jax: 0.10.0
libtpu: 0.0.40
codegen_flags: <defaults>
</compile_context>

<pallas_src>
import functools

import jax
import jax.numpy as jnp
from jax.experimental import pallas as pl
from jax.experimental.pallas import tpu as pltpu


def _round_up(x, m):
    return (x + m - 1) // m * m


def _double_conv_kernel(x_ref, mask_ref, w1_ref, b1_ref, w2_ref, b2_ref,
                        o_ref, xbuf_ref, hbuf_ref, pbuf_ref,
                        *, W, base, compute_dtype):
    # x_ref   : (1, Cin_p, H*W)     dense input image, channels padded to x8
    # mask_ref: (2, H*W) f32        row0: (j != 0), row1: (j != W-1)
    # w1_ref  : (Cmid_p, 9*Cin_p)   BN-folded, tap-major K layout
    # b1_ref  : (Cmid_p, 1)
    # w2_ref  : (Cout, 9*Cmid_p)
    # b2_ref  : (Cout, 1)
    # o_ref   : (1, Cout, H*W)
    # xbuf/hbuf: (C_p, BUFLEN)      flattened image with zero margins (padding)
    # pbuf    : (9*C_p_max, H*W)    im2col patch matrix (K on sublanes)
    HW = x_ref.shape[-1]

    masks = mask_ref[...]
    mask_l = masks[0:1, :]          # zero out j == 0     reads (kw == 0 taps)
    mask_r = masks[1:2, :]          # zero out j == W - 1 reads (kw == 2 taps)

    def conv3x3_relu(buf_ref, src, w_mat, b_col):
        c_p = buf_ref.shape[0]
        # In-kernel zero padding: zero the margins, drop the dense image at `base`
        # (aligned, lane-dense store).  Zero rows above/below supply the vertical
        # padding; the edge masks supply the horizontal padding.
        buf_ref[...] = jnp.zeros_like(buf_ref)
        buf_ref[:, pl.ds(base, HW)] = src
        # Build the (9*C_p, HW) patch matrix from 9 shifted lane-dim slices.
        for kh in range(3):
            for kw in range(3):
                t = kh * 3 + kw
                d = base + (kh - 1) * W + (kw - 1)          # static offset
                sl = buf_ref[:, pl.ds(d, HW)]               # (C_p, HW) lane slice
                if kw == 0:
                    sl = sl * mask_l                        # kill wrapped left reads
                elif kw == 2:
                    sl = sl * mask_r                        # kill wrapped right reads
                pbuf_ref[pl.ds(t * c_p, c_p), :] = sl       # aligned row-block store
        patches = pbuf_ref[pl.ds(0, 9 * c_p), :]            # (9*C_p, HW)
        # One fat MXU matmul per conv; f32 accumulation.
        y = jnp.dot(w_mat.astype(compute_dtype), patches.astype(compute_dtype),
                    preferred_element_type=jnp.float32)     # (C_out, HW)
        return jnp.maximum(y + b_col, 0.0)                  # bias + ReLU in f32

    h = conv3x3_relu(xbuf_ref, x_ref[0], w1_ref[...], b1_ref[...])  # stays in VMEM
    y = conv3x3_relu(hbuf_ref, h, w2_ref[...], b2_ref[...])
    o_ref[0] = y.astype(o_ref.dtype)                        # lane-dense (Cout, HW)


def fold_batchnorm(w, b, gamma, beta, mean, var, eps=1e-5):
    """Fold inference-mode BatchNorm into the preceding conv's weight/bias."""
    scale = gamma / jnp.sqrt(var + eps)
    return w * scale[:, None, None, None], (b - mean) * scale + beta


def _pack_weight(w, cin_p, cout_p):
    """(O, I, 3, 3) -> (cout_p, 9*cin_p) with K ordered as (kh, kw, cin)."""
    O, I, KH, KW = w.shape
    w = jnp.transpose(w, (0, 2, 3, 1))                                   # (O,3,3,I)
    w = jnp.pad(w, ((0, cout_p - O), (0, 0), (0, 0), (0, cin_p - I)))
    return w.reshape(cout_p, KH * KW * cin_p)


def double_conv(x, w1, b1, bn1, w2, b2, bn2, *, eps=1e-5,
                compute_dtype=jnp.float32):
    """Fused Conv3x3+BN+ReLU -> Conv3x3+BN+ReLU (stride 1, padding 1), NCHW."""
    N, Cin, H, W = x.shape
    Cmid = w1.shape[0]
    Cout = w2.shape[0]
    assert w1.shape[1:] == (Cin, 3, 3) and w2.shape[1:] == (Cmid, 3, 3)
    HW = H * W
    assert HW % 128 == 0, "H*W must be a multiple of 128 for lane-dense output"

    # Pad channel counts to sublane multiples (real UNet widths already are).
    cin_p = _round_up(Cin, 8)
    cmid_p = _round_up(Cmid, 8)

    # Fold BN (inference form) into the convs, then pre-pack weights into the
    # exact MXU-ready (Cout, 9*Cin) layout -- all once, wrapper-side.
    w1f, b1f = fold_batchnorm(w1, b1, *bn1, eps)
    w2f, b2f = fold_batchnorm(w2, b2, *bn2, eps)
    w1m = _pack_weight(w1f, cin_p, cmid_p)                   # (cmid_p, 9*cin_p)
    w2m = _pack_weight(w2f, cmid_p, Cout)                    # (Cout, 9*cmid_p)
    b1c = jnp.pad(b1f, (0, cmid_p - Cmid)).reshape(cmid_p, 1)
    b2c = b2f.reshape(Cout, 1)

    # NCHW -> (N, C, H*W) is a free reshape; channel pad is tiny (first layer only).
    x2 = x.reshape(N, Cin, HW)
    if cin_p != Cin:
        x2 = jnp.pad(x2, ((0, 0), (0, cin_p - Cin), (0, 0)))

    # 0/1 masks that kill the horizontally wrapped reads of the kw=0 / kw=2 taps.
    cols = jnp.arange(HW, dtype=jnp.int32) % W
    edge_mask = jnp.stack([cols != 0, cols != W - 1]).astype(jnp.float32)

    # Flattened-buffer geometry: image lives at [base, base+HW); tap (kh, kw) is a
    # contiguous slice at offset base + (kh-1)*W + (kw-1); margins stay zero.
    base = _round_up(W + 1, 128)
    buflen = _round_up(base + HW + W + 2, 128)

    kernel = functools.partial(_double_conv_kernel, W=W, base=base,
                               compute_dtype=compute_dtype)

    out = pl.pallas_call(
        kernel,
        out_shape=jax.ShapeDtypeStruct((N, Cout, HW), x.dtype),
        grid=(N,),
        in_specs=[
            pl.BlockSpec((1, cin_p, HW), lambda n: (n, 0, 0)),
            pl.BlockSpec((2, HW), lambda n: (0, 0)),               # edge masks
            pl.BlockSpec((cmid_p, 9 * cin_p), lambda n: (0, 0)),   # conv1 weight
            pl.BlockSpec((cmid_p, 1), lambda n: (0, 0)),           # conv1 bias
            pl.BlockSpec((Cout, 9 * cmid_p), lambda n: (0, 0)),    # conv2 weight
            pl.BlockSpec((Cout, 1), lambda n: (0, 0)),             # conv2 bias
        ],
        out_specs=pl.BlockSpec((1, Cout, HW), lambda n: (n, 0, 0)),
        scratch_shapes=[
            pltpu.VMEM((cin_p, buflen), jnp.float32),              # padded input
            pltpu.VMEM((cmid_p, buflen), jnp.float32),             # padded mid act
            pltpu.VMEM((9 * max(cin_p, cmid_p), HW), jnp.float32),  # patch matrix
        ],
        compiler_params=pltpu.CompilerParams(
            dimension_semantics=("parallel",),      # v7x: shard batch over 2 TCs
            vmem_limit_bytes=32 * 1024 * 1024,      # headroom for larger tiles
        ),
    )(x2, edge_mask, w1m, b1c, w2m, b2c)

    return out.reshape(N, Cout, H, W)               # free reshape back to NCHW


def reference_double_conv(x, w1, b1, bn1, w2, b2, bn2, eps=1e-5):
    def block(x, w, b, bn):
        gamma, beta, mean, var = bn
        y = jax.lax.conv_general_dilated(
            x, w, window_strides=(1, 1), padding=((1, 1), (1, 1)),
            dimension_numbers=("NCHW", "OIHW", "NCHW"),
            precision=jax.lax.Precision.HIGHEST)
        y = y + b.reshape(1, -1, 1, 1)
        y = (y - mean.reshape(1, -1, 1, 1)) * (
            gamma.reshape(1, -1, 1, 1) / jnp.sqrt(var.reshape(1, -1, 1, 1) + eps)
        ) + beta.reshape(1, -1, 1, 1)
        return jnp.maximum(y, 0.0)

    return block(block(x, w1, b1, bn1), w2, b2, bn2)


if __name__ == "__main__":
    key = jax.random.PRNGKey(0)
    ks = jax.random.split(key, 13)

    # double_conv(in_channels=4, out_channels=8) at small spatial size.
    N, Cin, Cout, H, W = 2, 4, 8, 16, 16

    x = jax.random.normal(ks[0], (N, Cin, H, W), dtype=jnp.float32)

    def conv_params(kw_, kb_, cin, cout):
        bound = 1.0 / (cin * 9) ** 0.5
        w = jax.random.uniform(kw_, (cout, cin, 3, 3), jnp.float32, -bound, bound)
        b = jax.random.uniform(kb_, (cout,), jnp.float32, -bound, bound)
        return w, b

    def bn_params(k0, k1, k2, k3, c):
        gamma = jax.random.uniform(k0, (c,), jnp.float32, 0.5, 1.5)
        beta = 0.1 * jax.random.normal(k1, (c,), dtype=jnp.float32)
        mean = 0.1 * jax.random.normal(k2, (c,), dtype=jnp.float32)
        var = jax.random.uniform(k3, (c,), jnp.float32, 0.5, 1.5)
        return gamma, beta, mean, var

    w1, b1 = conv_params(ks[1], ks[2], Cin, Cout)
    w2, b2 = conv_params(ks[3], ks[4], Cout, Cout)
    bn1 = bn_params(ks[5], ks[6], ks[7], ks[8], Cout)
    bn2 = bn_params(ks[9], ks[10], ks[11], ks[12], Cout)

    out = double_conv(x, w1, b1, bn1, w2, b2, bn2)
    out = jax.block_until_ready(out)

    ref = reference_double_conv(x, w1, b1, bn1, w2, b2, bn2)
    assert out.shape == (N, Cout, H, W)
    err = float(jnp.max(jnp.abs(out - ref)))
    assert jnp.allclose(out, ref, atol=1e-3, rtol=1e-3), f"max abs err = {err}"

    print("KERNEL_OK")
</pallas_src>

<mosaic_0001>
module attributes {stable_mosaic.version = 11 : i64} {
  func.func @_double_conv_kernel(%arg0: i32, %arg1: memref<1x8x256xf32, #tpu.memory_space<vmem>>, %arg2: memref<2x256xf32, #tpu.memory_space<vmem>>, %arg3: memref<8x72xf32, #tpu.memory_space<vmem>>, %arg4: memref<8x1xf32, #tpu.memory_space<vmem>>, %arg5: memref<8x72xf32, #tpu.memory_space<vmem>>, %arg6: memref<8x1xf32, #tpu.memory_space<vmem>>, %arg7: memref<1x8x256xf32, #tpu.memory_space<vmem>>, %arg8: memref<8x512xf32, #tpu.memory_space<vmem>>, %arg9: memref<8x512xf32, #tpu.memory_space<vmem>>, %arg10: memref<72x256xf32, #tpu.memory_space<vmem>>) attributes {dimension_semantics = [#tpu.dimension_semantics<parallel>], iteration_bounds = array<i64: 2>, scalar_prefetch = 0 : i64, scratch_operands = 3 : i64, tpu.core_type = #tpu.core_type<tc>, window_params = [{transform_indices = @transform_0, window_bounds = array<i64: 1, 8, 256>}, {pipeline_mode = #tpu.pipeline_mode<synchronous>, transform_indices = @transform_1, window_bounds = array<i64: 2, 256>}, {pipeline_mode = #tpu.pipeline_mode<synchronous>, transform_indices = @transform_2, window_bounds = array<i64: 8, 72>}, {pipeline_mode = #tpu.pipeline_mode<synchronous>, transform_indices = @transform_3, window_bounds = array<i64: 8, 1>}, {pipeline_mode = #tpu.pipeline_mode<synchronous>, transform_indices = @transform_4, window_bounds = array<i64: 8, 72>}, {pipeline_mode = #tpu.pipeline_mode<synchronous>, transform_indices = @transform_5, window_bounds = array<i64: 8, 1>}, {transform_indices = @transform_6, window_bounds = array<i64: 1, 8, 256>}]} {
    %c0 = arith.constant 0 : index
    %c0_0 = arith.constant 0 : index
    %0 = vector.load %arg2[%c0, %c0_0] : memref<2x256xf32, #tpu.memory_space<vmem>>, vector<2x256xf32>
    %1 = vector.extract_strided_slice %0 {offsets = [0, 0], sizes = [1, 256], strides = [1, 1]} : vector<2x256xf32> to vector<1x256xf32>
    %2 = vector.extract_strided_slice %0 {offsets = [1, 0], sizes = [1, 256], strides = [1, 1]} : vector<2x256xf32> to vector<1x256xf32>
    %c0_1 = arith.constant 0 : index
    %c0_2 = arith.constant 0 : index
    %c0_3 = arith.constant 0 : index
    %3 = vector.load %arg1[%c0_1, %c0_2, %c0_3] : memref<1x8x256xf32, #tpu.memory_space<vmem>>, vector<1x8x256xf32>
    %4 = vector.shape_cast %3 : vector<1x8x256xf32> to vector<8x256xf32>
    %c0_4 = arith.constant 0 : index
    %c0_5 = arith.constant 0 : index
    %5 = vector.load %arg3[%c0_4, %c0_5] : memref<8x72xf32, #tpu.memory_space<vmem>>, vector<8x72xf32>
    %c0_6 = arith.constant 0 : index
    %c0_7 = arith.constant 0 : index
    %6 = vector.load %arg4[%c0_6, %c0_7] : memref<8x1xf32, #tpu.memory_space<vmem>>, vector<8x1xf32>
    %cst = arith.constant 0.000000e+00 : f32
    %7 = vector.broadcast %cst : f32 to vector<8x512xf32>
    %c0_8 = arith.constant 0 : index
    %c0_9 = arith.constant 0 : index
    %8 = vector.load %arg8[%c0_8, %c0_9] : memref<8x512xf32, #tpu.memory_space<vmem>>, vector<8x512xf32>
    tpu.vector_store %arg8[%c0_8, %c0_9], %7 {strides = array<i32>} : memref<8x512xf32, #tpu.memory_space<vmem>>, vector<8x512xf32>,
    %c0_10 = arith.constant 0 : index
    %c128 = arith.constant 128 : index
    %9 = vector.load %arg8[%c0_10, %c128] : memref<8x512xf32, #tpu.memory_space<vmem>>, vector<8x256xf32>
    tpu.vector_store %arg8[%c0_10, %c128], %4 {strides = array<i32>} : memref<8x512xf32, #tpu.memory_space<vmem>>, vector<8x256xf32>,
    %c0_11 = arith.constant 0 : index
    %c111 = arith.constant 111 : index
    %10 = vector.load %arg8[%c0_11, %c111] : memref<8x512xf32, #tpu.memory_space<vmem>>, vector<8x256xf32>
    %11 = vector.broadcast %1 : vector<1x256xf32> to vector<8x256xf32>
    %12 = arith.mulf %10, %11 : vector<8x256xf32>
    %c0_12 = arith.constant 0 : index
    %c0_13 = arith.constant 0 : index
    %13 = vector.load %arg10[%c0_12, %c0_13] : memref<72x256xf32, #tpu.memory_space<vmem>>, vector<8x256xf32>
    tpu.vector_store %arg10[%c0_12, %c0_13], %12 {strides = array<i32>} : memref<72x256xf32, #tpu.memory_space<vmem>>, vector<8x256xf32>,
    %c0_14 = arith.constant 0 : index
    %c112 = arith.constant 112 : index
    %14 = vector.load %arg8[%c0_14, %c112] : memref<8x512xf32, #tpu.memory_space<vmem>>, vector<8x256xf32>
    %c8 = arith.constant 8 : index
    %c0_15 = arith.constant 0 : index
    %15 = vector.load %arg10[%c8, %c0_15] : memref<72x256xf32, #tpu.memory_space<vmem>>, vector<8x256xf32>
    tpu.vector_store %arg10[%c8, %c0_15], %14 {strides = array<i32>} : memref<72x256xf32, #tpu.memory_space<vmem>>, vector<8x256xf32>,
    %c0_16 = arith.constant 0 : index
    %c113 = arith.constant 113 : index
    %16 = vector.load %arg8[%c0_16, %c113] : memref<8x512xf32, #tpu.memory_space<vmem>>, vector<8x256xf32>
    %17 = vector.broadcast %2 : vector<1x256xf32> to vector<8x256xf32>
    %18 = arith.mulf %16, %17 : vector<8x256xf32>
    %c16 = arith.constant 16 : index
    %c0_17 = arith.constant 0 : index
    %19 = vector.load %arg10[%c16, %c0_17] : memref<72x256xf32, #tpu.memory_space<vmem>>, vector<8x256xf32>
    tpu.vector_store %arg10[%c16, %c0_17], %18 {strides = array<i32>} : memref<72x256xf32, #tpu.memory_space<vmem>>, vector<8x256xf32>,
    %c0_18 = arith.constant 0 : index
    %c127 = arith.constant 127 : index
    %20 = vector.load %arg8[%c0_18, %c127] : memref<8x512xf32, #tpu.memory_space<vmem>>, vector<8x256xf32>
    %21 = vector.broadcast %1 : vector<1x256xf32> to vector<8x256xf32>
    %22 = arith.mulf %20, %21 : vector<8x256xf32>
    %c24 = arith.constant 24 : index
    %c0_19 = arith.constant 0 : index
    %23 = vector.load %arg10[%c24, %c0_19] : memref<72x256xf32, #tpu.memory_space<vmem>>, vector<8x256xf32>
    tpu.vector_store %arg10[%c24, %c0_19], %22 {strides = array<i32>} : memref<72x256xf32, #tpu.memory_space<vmem>>, vector<8x256xf32>,
    %c0_20 = arith.constant 0 : index
    %c128_21 = arith.constant 128 : index
    %24 = vector.load %arg8[%c0_20, %c128_21] : memref<8x512xf32, #tpu.memory_space<vmem>>, vector<8x256xf32>
    %c32 = arith.constant 32 : index
    %c0_22 = arith.constant 0 : index
    %25 = vector.load %arg10[%c32, %c0_22] : memref<72x256xf32, #tpu.memory_space<vmem>>, vector<8x256xf32>
    tpu.vector_store %arg10[%c32, %c0_22], %24 {strides = array<i32>} : memref<72x256xf32, #tpu.memory_space<vmem>>, vector<8x256xf32>,
    %c0_23 = arith.constant 0 : index
    %c129 = arith.constant 129 : index
    %26 = vector.load %arg8[%c0_23, %c129] : memref<8x512xf32, #tpu.memory_space<vmem>>, vector<8x256xf32>
    %27 = vector.broadcast %2 : vector<1x256xf32> to vector<8x256xf32>
    %28 = arith.mulf %26, %27 : vector<8x256xf32>
    %c40 = arith.constant 40 : index
    %c0_24 = arith.constant 0 : index
    %29 = vector.load %arg10[%c40, %c0_24] : memref<72x256xf32, #tpu.memory_space<vmem>>, vector<8x256xf32>
    tpu.vector_store %arg10[%c40, %c0_24], %28 {strides = array<i32>} : memref<72x256xf32, #tpu.memory_space<vmem>>, vector<8x256xf32>,
    %c0_25 = arith.constant 0 : index
    %c143 = arith.constant 143 : index
    %30 = vector.load %arg8[%c0_25, %c143] : memref<8x512xf32, #tpu.memory_space<vmem>>, vector<8x256xf32>
    %31 = vector.broadcast %1 : vector<1x256xf32> to vector<8x256xf32>
    %32 = arith.mulf %30, %31 : vector<8x256xf32>
    %c48 = arith.constant 48 : index
    %c0_26 = arith.constant 0 : index
    %33 = vector.load %arg10[%c48, %c0_26] : memref<72x256xf32, #tpu.memory_space<vmem>>, vector<8x256xf32>
    tpu.vector_store %arg10[%c48, %c0_26], %32 {strides = array<i32>} : memref<72x256xf32, #tpu.memory_space<vmem>>, vector<8x256xf32>,
    %c0_27 = arith.constant 0 : index
    %c144 = arith.constant 144 : index
    %34 = vector.load %arg8[%c0_27, %c144] : memref<8x512xf32, #tpu.memory_space<vmem>>, vector<8x256xf32>
    %c56 = arith.constant 56 : index
    %c0_28 = arith.constant 0 : index
    %35 = vector.load %arg10[%c56, %c0_28] : memref<72x256xf32, #tpu.memory_space<vmem>>, vector<8x256xf32>
    tpu.vector_store %arg10[%c56, %c0_28], %34 {strides = array<i32>} : memref<72x256xf32, #tpu.memory_space<vmem>>, vector<8x256xf32>,
    %c0_29 = arith.constant 0 : index
    %c145 = arith.constant 145 : index
    %36 = vector.load %arg8[%c0_29, %c145] : memref<8x512xf32, #tpu.memory_space<vmem>>, vector<8x256xf32>
    %37 = vector.broadcast %2 : vector<1x256xf32> to vector<8x256xf32>
    %38 = arith.mulf %36, %37 : vector<8x256xf32>
    %c64 = arith.constant 64 : index
    %c0_30 = arith.constant 0 : index
    %39 = vector.load %arg10[%c64, %c0_30] : memref<72x256xf32, #tpu.memory_space<vmem>>, vector<8x256xf32>
    tpu.vector_store %arg10[%c64, %c0_30], %38 {strides = array<i32>} : memref<72x256xf32, #tpu.memory_space<vmem>>, vector<8x256xf32>,
    %c0_31 = arith.constant 0 : index
    %c0_32 = arith.constant 0 : index
    %40 = vector.load %arg10[%c0_31, %c0_32] : memref<72x256xf32, #tpu.memory_space<vmem>>, vector<72x256xf32>
    %cst_33 = arith.constant dense<0.000000e+00> : vector<8x256xf32>
    %41 = tpu.matmul %5, %40, %cst_33 {dimension_numbers = #tpu.dot_dimension_numbers<[1], [0], [0], [1], [0, 0, 1, 1], [], []>} : vector<8x72xf32>, vector<72x256xf32>, vector<8x256xf32> -> vector<8x256xf32>
    %42 = vector.broadcast %6 : vector<8x1xf32> to vector<8x256xf32>
    %43 = arith.addf %41, %42 : vector<8x256xf32>
    %cst_34 = arith.constant 0.000000e+00 : f32
    %44 = vector.broadcast %cst_34 : f32 to vector<8x256xf32>
    %45 = arith.maximumf %43, %44 : vector<8x256xf32>
    %c0_35 = arith.constant 0 : index
    %c0_36 = arith.constant 0 : index
    %46 = vector.load %arg5[%c0_35, %c0_36] : memref<8x72xf32, #tpu.memory_space<vmem>>, vector<8x72xf32>
    %c0_37 = arith.constant 0 : index
    %c0_38 = arith.constant 0 : index
    %47 = vector.load %arg6[%c0_37, %c0_38] : memref<8x1xf32, #tpu.memory_space<vmem>>, vector<8x1xf32>
    %cst_39 = arith.constant 0.000000e+00 : f32
    %48 = vector.broadcast %cst_39 : f32 to vector<8x512xf32>
    %c0_40 = arith.constant 0 : index
    %c0_41 = arith.constant 0 : index
    %49 = vector.load %arg9[%c0_40, %c0_41] : memref<8x512xf32, #tpu.memory_space<vmem>>, vector<8x512xf32>
    tpu.vector_store %arg9[%c0_40, %c0_41], %48 {strides = array<i32>} : memref<8x512xf32, #tpu.memory_space<vmem>>, vector<8x512xf32>,
    %c0_42 = arith.constant 0 : index
    %c128_43 = arith.constant 128 : index
    %50 = vector.load %arg9[%c0_42, %c128_43] : memref<8x512xf32, #tpu.memory_space<vmem>>, vector<8x256xf32>
    tpu.vector_store %arg9[%c0_42, %c128_43], %45 {strides = array<i32>} : memref<8x512xf32, #tpu.memory_space<vmem>>, vector<8x256xf32>,
    %c0_44 = arith.constant 0 : index
    %c111_45 = arith.constant 111 : index
    %51 = vector.load %arg9[%c0_44, %c111_45] : memref<8x512xf32, #tpu.memory_space<vmem>>, vector<8x256xf32>
    %52 = vector.broadcast %1 : vector<1x256xf32> to vector<8x256xf32>
    %53 = arith.mulf %51, %52 : vector<8x256xf32>
    %c0_46 = arith.constant 0 : index
    %c0_47 = arith.constant 0 : index
    %54 = vector.load %arg10[%c0_46, %c0_47] : memref<72x256xf32, #tpu.memory_space<vmem>>, vector<8x256xf32>
    tpu.vector_store %arg10[%c0_46, %c0_47], %53 {strides = array<i32>} : memref<72x256xf32, #tpu.memory_space<vmem>>, vector<8x256xf32>,
    %c0_48 = arith.constant 0 : index
    %c112_49 = arith.constant 112 : index
    %55 = vector.load %arg9[%c0_48, %c112_49] : memref<8x512xf32, #tpu.memory_space<vmem>>, vector<8x256xf32>
    %c8_50 = arith.constant 8 : index
    %c0_51 = arith.constant 0 : index
    %56 = vector.load %arg10[%c8_50, %c0_51] : memref<72x256xf32, #tpu.memory_space<vmem>>, vector<8x256xf32>
    tpu.vector_store %arg10[%c8_50, %c0_51], %55 {strides = array<i32>} : memref<72x256xf32, #tpu.memory_space<vmem>>, vector<8x256xf32>,
    %c0_52 = arith.constant 0 : index
    %c113_53 = arith.constant 113 : index
    %57 = vector.load %arg9[%c0_52, %c113_53] : memref<8x512xf32, #tpu.memory_space<vmem>>, vector<8x256xf32>
    %58 = vector.broadcast %2 : vector<1x256xf32> to vector<8x256xf32>
    %59 = arith.mulf %57, %58 : vector<8x256xf32>
    %c16_54 = arith.constant 16 : index
    %c0_55 = arith.constant 0 : index
    %60 = vector.load %arg10[%c16_54, %c0_55] : memref<72x256xf32, #tpu.memory_space<vmem>>, vector<8x256xf32>
    tpu.vector_store %arg10[%c16_54, %c0_55], %59 {strides = array<i32>} : memref<72x256xf32, #tpu.memory_space<vmem>>, vector<8x256xf32>,
    %c0_56 = arith.constant 0 : index
    %c127_57 = arith.constant 127 : index
    %61 = vector.load %arg9[%c0_56, %c127_57] : memref<8x512xf32, #tpu.memory_space<vmem>>, vector<8x256xf32>
    %62 = vector.broadcast %1 : vector<1x256xf32> to vector<8x256xf32>
    %63 = arith.mulf %61, %62 : vector<8x256xf32>
    %c24_58 = arith.constant 24 : index
    %c0_59 = arith.constant 0 : index
    %64 = vector.load %arg10[%c24_58, %c0_59] : memref<72x256xf32, #tpu.memory_space<vmem>>, vector<8x256xf32>
    tpu.vector_store %arg10[%c24_58, %c0_59], %63 {strides = array<i32>} : memref<72x256xf32, #tpu.memory_space<vmem>>, vector<8x256xf32>,
    %c0_60 = arith.constant 0 : index
    %c128_61 = arith.constant 128 : index
    %65 = vector.load %arg9[%c0_60, %c128_61] : memref<8x512xf32, #tpu.memory_space<vmem>>, vector<8x256xf32>
    %c32_62 = arith.constant 32 : index
    %c0_63 = arith.constant 0 : index
    %66 = vector.load %arg10[%c32_62, %c0_63] : memref<72x256xf32, #tpu.memory_space<vmem>>, vector<8x256xf32>
    tpu.vector_store %arg10[%c32_62, %c0_63], %65 {strides = array<i32>} : memref<72x256xf32, #tpu.memory_space<vmem>>, vector<8x256xf32>,
    %c0_64 = arith.constant 0 : index
    %c129_65 = arith.constant 129 : index
    %67 = vector.load %arg9[%c0_64, %c129_65] : memref<8x512xf32, #tpu.memory_space<vmem>>, vector<8x256xf32>
    %68 = vector.broadcast %2 : vector<1x256xf32> to vector<8x256xf32>
    %69 = arith.mulf %67, %68 : vector<8x256xf32>
    %c40_66 = arith.constant 40 : index
    %c0_67 = arith.constant 0 : index
    %70 = vector.load %arg10[%c40_66, %c0_67] : memref<72x256xf32, #tpu.memory_space<vmem>>, vector<8x256xf32>
    tpu.vector_store %arg10[%c40_66, %c0_67], %69 {strides = array<i32>} : memref<72x256xf32, #tpu.memory_space<vmem>>, vector<8x256xf32>,
    %c0_68 = arith.constant 0 : index
    %c143_69 = arith.constant 143 : index
    %71 = vector.load %arg9[%c0_68, %c143_69] : memref<8x512xf32, #tpu.memory_space<vmem>>, vector<8x256xf32>
    %72 = vector.broadcast %1 : vector<1x256xf32> to vector<8x256xf32>
    %73 = arith.mulf %71, %72 : vector<8x256xf32>
    %c48_70 = arith.constant 48 : index
    %c0_71 = arith.constant 0 : index
    %74 = vector.load %arg10[%c48_70, %c0_71] : memref<72x256xf32, #tpu.memory_space<vmem>>, vector<8x256xf32>
    tpu.vector_store %arg10[%c48_70, %c0_71], %73 {strides = array<i32>} : memref<72x256xf32, #tpu.memory_space<vmem>>, vector<8x256xf32>,
    %c0_72 = arith.constant 0 : index
    %c144_73 = arith.constant 144 : index
    %75 = vector.load %arg9[%c0_72, %c144_73] : memref<8x512xf32, #tpu.memory_space<vmem>>, vector<8x256xf32>
    %c56_74 = arith.constant 56 : index
    %c0_75 = arith.constant 0 : index
    %76 = vector.load %arg10[%c56_74, %c0_75] : memref<72x256xf32, #tpu.memory_space<vmem>>, vector<8x256xf32>
    tpu.vector_store %arg10[%c56_74, %c0_75], %75 {strides = array<i32>} : memref<72x256xf32, #tpu.memory_space<vmem>>, vector<8x256xf32>,
    %c0_76 = arith.constant 0 : index
    %c145_77 = arith.constant 145 : index
    %77 = vector.load %arg9[%c0_76, %c145_77] : memref<8x512xf32, #tpu.memory_space<vmem>>, vector<8x256xf32>
    %78 = vector.broadcast %2 : vector<1x256xf32> to vector<8x256xf32>
    %79 = arith.mulf %77, %78 : vector<8x256xf32>
    %c64_78 = arith.constant 64 : index
    %c0_79 = arith.constant 0 : index
    %80 = vector.load %arg10[%c64_78, %c0_79] : memref<72x256xf32, #tpu.memory_space<vmem>>, vector<8x256xf32>
    tpu.vector_store %arg10[%c64_78, %c0_79], %79 {strides = array<i32>} : memref<72x256xf32, #tpu.memory_space<vmem>>, vector<8x256xf32>,
    %c0_80 = arith.constant 0 : index
    %c0_81 = arith.constant 0 : index
    %81 = vector.load %arg10[%c0_80, %c0_81] : memref<72x256xf32, #tpu.memory_space<vmem>>, vector<72x256xf32>
    %cst_82 = arith.constant dense<0.000000e+00> : vector<8x256xf32>
    %82 = tpu.matmul %46, %81, %cst_82 {dimension_numbers = #tpu.dot_dimension_numbers<[1], [0], [0], [1], [0, 0, 1, 1], [], []>} : vector<8x72xf32>, vector<72x256xf32>, vector<8x256xf32> -> vector<8x256xf32>
    %83 = vector.broadcast %47 : vector<8x1xf32> to vector<8x256xf32>
    %84 = arith.addf %82, %83 : vector<8x256xf32>
    %cst_83 = arith.constant 0.000000e+00 : f32
    %85 = vector.broadcast %cst_83 : f32 to vector<8x256xf32>
    %86 = arith.maximumf %84, %85 : vector<8x256xf32>
    %c0_84 = arith.constant 0 : index
    %c0_85 = arith.constant 0 : index
    %c0_86 = arith.constant 0 : index
    %87 = vector.load %arg7[%c0_84, %c0_85, %c0_86] : memref<1x8x256xf32, #tpu.memory_space<vmem>>, vector<1x8x256xf32>
    %88 = vector.shape_cast %87 : vector<1x8x256xf32> to vector<8x256xf32>
    %89 = vector.shape_cast %86 : vector<8x256xf32> to vector<1x8x256xf32>
    tpu.vector_store %arg7[%c0_84, %c0_85, %c0_86], %89 {strides = array<i32>} : memref<1x8x256xf32, #tpu.memory_space<vmem>>, vector<1x8x256xf32>,
    return
  }
  func.func @transform_0(%arg0: i32) -> (i32, i32, i32) {
    %c0_i32 = arith.constant 0 : i32
    %c0_i32_0 = arith.constant 0 : i32
    %c0_i32_1 = arith.constant 0 : i32
    return %arg0, %c0_i32, %c0_i32_0 : i32, i32, i32
  }
  func.func @transform_1(%arg0: i32) -> (i32, i32) {
    %c0_i32 = arith.constant 0 : i32
    %c0_i32_0 = arith.constant 0 : i32
    %c0_i32_1 = arith.constant 0 : i32
    return %c0_i32, %c0_i32_0 : i32, i32
  }
  func.func @transform_2(%arg0: i32) -> (i32, i32) {
    %c0_i32 = arith.constant 0 : i32
    %c0_i32_0 = arith.constant 0 : i32
    %c0_i32_1 = arith.constant 0 : i32
    return %c0_i32, %c0_i32_0 : i32, i32
  }
  func.func @transform_3(%arg0: i32) -> (i32, i32) {
    %c0_i32 = arith.constant 0 : i32
    %c0_i32_0 = arith.constant 0 : i32
    %c0_i32_1 = arith.constant 0 : i32
    return %c0_i32, %c0_i32_0 : i32, i32
  }
  func.func @transform_4(%arg0: i32) -> (i32, i32) {
    %c0_i32 = arith.constant 0 : i32
    %c0_i32_0 = arith.constant 0 : i32
    %c0_i32_1 = arith.constant 0 : i32
    return %c0_i32, %c0_i32_0 : i32, i32
  }
  func.func @transform_5(%arg0: i32) -> (i32, i32) {
    %c0_i32 = arith.constant 0 : i32
    %c0_i32_0 = arith.constant 0 : i32
    %c0_i32_1 = arith.constant 0 : i32
    return %c0_i32, %c0_i32_0 : i32, i32
  }
  func.func @transform_6(%arg0: i32) -> (i32, i32, i32) {
    %c0_i32 = arith.constant 0 : i32
    %c0_i32_0 = arith.constant 0 : i32
    %c0_i32_1 = arith.constant 0 : i32
    return %arg0, %c0_i32, %c0_i32_0 : i32, i32, i32
  }
}

</mosaic_0001>

<bundles_post_ra>
// kernel: tpu_custom_call.1
= control target key start
LH: loop header
LB: loop body
LE: loop exit
PB: predicated region body
PF: predicated region fallthrough
CT: control target
= control target key end

     0   :  { %s1679_s0 = inlined_call_operand.hbm [shape: f32[2,8,256], index: 0, kind: input, shape index: {}]   ;;  %s1680_s1 = inlined_call_operand.hbm [shape: f32[2,256], index: 1, kind: input, shape index: {}]   ;;  %s1681_s2 = inlined_call_operand.vmem [shape: f32[8,72], index: 2, kind: input, shape index: {}]   ;;  %s1682_s3 = inlined_call_operand.vmem [shape: f32[8,1], index: 3, kind: input, shape index: {}]   ;;  %s1683_s4 = inlined_call_operand.vmem [shape: f32[8,72], index: 4, kind: input, shape index: {}]   ;;  %s1684_s5 = inlined_call_operand.vmem [shape: f32[8,1], index: 5, kind: input, shape index: {}]   ;;  %s1685_s6 = inlined_call_operand.hbm [shape: f32[2,8,256], index: 6, kind: output, shape index: {}]  }
   0x1   :  { %1690 = sst [smem:[#allocation14_spill]] %s1680_s1 }
   0x2   :  { %11 = vsyncpa [#allocation6], 0 }
   0x3   :  { %13 = vsyncpa [#allocation6 + $0x1], 0 }
   0x4   :  { %14 = vsyncpa [#allocation9], 0 }
   0x5   :  { %15 = vsyncpa [#allocation7], 0 }
   0x6   :  { %17 = vsyncpa [#allocation7 + $0x1], 0  ;;  %s1285_s21 = smov 0   ;;  %s1287_s22 = smov 0  }
   0x7   :  { %s1289_s23 = smov 0   ;;  %s1291_s24 = smov 0  }
   0x8 LB: > { %s1306_s25 = sadd.s32 4294967295, %s1235_s24   ;;  %s1025_s26 = sadd.s32 4294967294, %s1235_s24   ;;  %s1235_s24 = sphi %s1291_s24, %s1710_s24   ;;  %s1231_s23 = sphi %s1289_s23, %s1709_s23   ;;  %s1227_s22 = sphi %s1287_s22, %s1708_s22   ;;  %s1223_s21 = sphi %s1285_s21, %s1707_s21  }
   0x9   : > { %p43_p0 = scmp.ne.s32.totalorder %s1227_s22, %s1223_s21  ;;  %p1686_p1 = scmp.eq.s32.totalorder %s1306_s25, 0 }
   0xa   : > { %p178_p3 = scmp.eq.s32.totalorder %s1025_s26, 1  ;;  %p1026_p5 = scmp.ge.s32.totalorder %s1235_s24, 1 }
   0xb   : > { %p1315_p4 = por %p1686_p1, %p43_p0  ;;  %p185_p7 = scmp.lt.s32.totalorder %s1235_s24, 3 }
   0xc   : > { %p1320_p6 = por %p178_p3, %p43_p0  ;;  %s1237_s30 = smov [#allocation8]  }
   0xd   : > { %s1691_s27 = scalar_select %p1315_p4, 1, 0 }
   0xe   : > { %s1692_s28 = scalar_select %p1320_p6, 1, 0 }
   0xf   : > { %p1325_p8 = pnand %p1026_p5, %p185_p7  ;;  %s198_s7 = sshll.u32 %s1237_s30, 4  ;;  %s199_s7 = int_to_ptr.vmem [resolvable:$true] %s198_s7 }
  0x10   : > { %s1333_s8 = sadd.s32 1, %s1235_s24   ;;  %s30_s12 = sadd.s32 1, %s1231_s23 }
  0x11   : > { %s1693_s29 = scalar_select %p1325_p8, 1, 0 }
  0x12   : > { %p1053_p10 = pneg %p1325_p8  ;;  %s27_s10 = ssub.s32 %s1235_s24, %s1333_s8 }
  0x13   : > { %p1343_p12 = scmp.eq.s32.totalorder %s27_s10, 0  ;;  %p37_p13 = scmp.ne.s32.totalorder %s1231_s23, %s1227_s22 }
  0x14   : > { %p1337_p11 = pnand %p1053_p10, %p1686_p1  ;;  %s1124_s13 = scalar_lea.vmem %s199_s7, 64 }
  0x15   : > { %p1125_p3 = scmp.ne.s32.totalorder %s199_s7, %s1124_s13  ;;  %p1132_p9 = scmp.lt.s32.totalorder %s199_s7, %s199_s7 }
  0x16   : > { %p1115_p0 = pneg %p1337_p11  ;;  %p1133_p2 = scmp.lt.s32.totalorder %s1124_s13, %s1124_s13 }
  0x18   : > { %p1127_p5 = pnand %p1125_p3, %p1115_p0  ;;  %p1134_p10 = por %p1133_p2, %p1132_p9 }
  0x1a   : > { %p1128_p7 = pneg %p1127_p5 }
  0x1c   : > { %p1135_p1 = pnand %p1134_p10, %p1128_p7 }
  0x1e   : > { %1138 = shalt.err (!%p1135_p1)
}
  0x1f   : > { %s1696_s1 = sld [smem:[#allocation14_spill]]  ;;  %p38_p1 = scmp.eq.s32.totalorder %s1235_s24, 0 }
  0x20   : > { %s1360_s16 = scalar_select %p1343_p12, %s1231_s23, %s30_s12  }
  0x21   : > { %p1697_p2 = scmp.eq.s32.totalorder %s1306_s25, 1  ;;  %p1066_p0 = scmp.lt.s32.totalorder %s1235_s24, 2 }
  0x22   : > { %s221_s18 = sand.u32 1, %s1231_s23   ;;  %p39_p3 = por %p38_p1, %p37_p13 }
  0x23   : > { %p1368_p9 = por %p1697_p2, %p37_p13  ;;  %s1029_s19 = sshll.u32 %s221_s18, 4 }
  0x24   : > { %s1043_s20 = sshll.u32 %s1235_s24, 8  ;;  %s225_s9 = scalar_lea.vmem [#allocation5], %s1029_s19 }
  0x25   : > { %1056 = dma.hbm_to_vmem [thread:$0]  (!%p1337_p11), %s1696_s1, 64, %s199_s7, [#allocation9]  }
  0x26   : > { %s1698_s17 = scalar_select %p1368_p9, 1, 0 }
  0x27   : > { %s1381_s7 = scalar_lea.hbm %s1679_s0, %s1043_s20  ;;  %s233_s10 = sshll.u32 %s225_s9, 4  ;;  %s234_s10 = int_to_ptr.vmem [resolvable:$true] %s233_s10 }
  0x28   : > { %p1383_p11 = pnand %p1066_p0, %p39_p3  ;;  %s222_s12 = scalar_lea.sflag [#allocation6], %s221_s18 }
  0x29   : > { %s1139_s13 = scalar_lea.hbm %s1381_s7, 256  ;;  %s1144_s20 = scalar_lea.hbm %s1679_s0, 512 }
  0x2a   : > { %p1140_p12 = scmp.ne.s32.totalorder %s1381_s7, %s1139_s13  ;;  %p1141_p13 = pneg %p1383_p11 }
  0x2b   : > { %p1145_p10 = scmp.lt.s32.totalorder %s1381_s7, %s1679_s0  ;;  %p1146_p1 = scmp.lt.s32.totalorder %s1144_s20, %s1139_s13 }
  0x2c   : > { %p1142_p5 = pnand %p1141_p13, %p1140_p12 }
  0x2d   : > { %p1147_p2 = por %p1146_p1, %p1145_p10 }
  0x2e   : > { %p1143_p7 = pneg %p1142_p5 }
  0x30   : > { %p1148_p0 = pnand %p1147_p2, %p1143_p7 }
  0x32   : > { %1151 = shalt.err (!%p1148_p0)
}
  0x33   : > { %s1152_s30 = scalar_lea.vmem %s234_s10, 256  ;;  %s1238_s18 = smov [#allocation5]  }
  0x34   : > { %p1153_p3 = scmp.ne.s32.totalorder %s234_s10, %s1152_s30  ;;  %s1157_s9 = sshll.u32 %s1238_s18, 4  ;;  %s1158_s9 = int_to_ptr.vmem [resolvable:$false] %s1157_s9 }
  0x35   : > { %s1159_s1 = scalar_lea.vmem %s1158_s9, 512  ;;  %p1160_p12 = scmp.lt.s32.totalorder %s234_s10, %s1158_s9 }
  0x36   : > { %p1155_p6 = pnand %p1153_p3, %p1141_p13  ;;  %p1161_p5 = scmp.lt.s32.totalorder %s1159_s1, %s1152_s30 }
  0x38   : > { %p1156_p9 = pneg %p1155_p6  ;;  %p1162_p4 = por %p1161_p5, %p1160_p12 }
  0x3a   : > { %p1163_p8 = pnand %p1162_p4, %p1156_p9 }
  0x3c   : > { %1166 = shalt.err (!%p1163_p8)
}
  0x3d   : > { %1060 = dma.hbm_to_vmem [thread:$0]  (!%p1383_p11), %s1381_s7, 256, %s234_s10, %s222_s12  }
  0x3e   : > { %p1700_p7 = scmp.ne.s32.totalorder %s1693_s29, 0 }
  0x3f   : > { %s1404_s13 = sand.u32 (!%p1700_p7), 1, %s1227_s22   ;;  %p1701_p4 = scmp.ne.s32.totalorder (!%p1700_p7), %s1691_s27, 0 }
  0x40   : > { %242 = sbr.rel (%p1700_p7) target bundleno = 916 (0x394), region = 44  ;;  %s1033_s14 = sshll.u32 (!%p1700_p7), %s1404_s13, 4 }
  0x41   : > { %s245_s15 = scalar_lea.sflag (!%p1700_p7), [#allocation6], %s1404_s13  ;;  %s1410_s1 = scalar_lea.vmem (!%p1700_p7), [#allocation5], %s1033_s14 }
  0x45   : > { %1210 = dma.done.wait (%p1701_p4), %s245_s15, 256  }
  0x46   : > { %1212 = vsyncadd (%p1701_p4), %s245_s15, 4294967040  ;;  %p1702_p6 = scmp.eq.s32.totalorder %s1306_s25, 0 }
  0x48   : > { %1214 = dma.done.wait (%p1702_p6), [#allocation9], 64   ;;  %p1703_p8 = pmov %p1702_p6 }
  0x49   : > { %v296_v0 = vlaneseq  ;;  %v1239_v1 = vmov 0.0   ;;  %v281_v7 = vld [vmem:[#allocation8] sm:$0xf]  ;;  %s1240_s27 = smov 17   ;;  %s1241_s29 = smov 15   ;;  %v1435_v16 = vld [vmem:[%s1410_s1 + $0x8] sm:$0xff] }
  0x4a   : > { %1216 = vsyncadd (%p1703_p8), [#allocation9], 4294967232  ;;  %646 = vmatprep.mubr.f32.mxu0 %v1239_v1  ;;  %919 = vmatprep.mubr.f32.mxu1 %v1239_v1  ;;  %s1242_s7 = smov 1   ;;  %s1243_s10 = smov 127   ;;  %v1442_v17 = vld [vmem:[%s1410_s1] sm:$0xff]  ;;  %v1247_v18 = vmov 0  }
  0x4b   : > { %v297_v2 = vshrl.u32 %v296_v0, 7  ;;  %s1244_s11 = smov 113   ;;  %s1245_s12 = smov 111   ;;  %1112 = vset.pattern.permute.xlu0 %v1247_v18  ;;  %vm337_vm0 = vcmask 138240   ;;  %vm407_vm1 = vcmask 121856   ;;  %vm438_vm2 = vcmask 7168  }
  0x4c   : > { %s1246_s20 = smov 112   ;;  %s1248_s26 = smov 16   ;;  %vm421_vm3 = vcmask 1039360   ;;  %vm390_vm4 = vcmask 924672   ;;  %vm320_vm5 = vcmask 908288   ;;  %v285_v55 = vld [vmem:[%s1682_s3] sm:$0xff] }
  0x4d   : > { %v368_v3 = vsub.s32 1, %v297_v2  ;;  %v298_v4 = vsub.s32 0, %v297_v2  ;;  %v372_v5 = vsub.s32 3, %v297_v2  ;;  %v302_v6 = vsub.s32 2, %v297_v2  ;;  %s931_s19 = scalar_lea.sflag [#allocation7], %s1404_s13  ;;  %p1704_p11 = scmp.ne.s32.totalorder %s1698_s17, 0 }
  0x4e   : > { %vm519_vm6 = vcmask 916480   ;;  %vm356_vm7 = vcmask 130048   ;;  %vm578_vm8 = vcmask 588800  }
  0x4f   : > { %v369_v8 = vrot.slane %v281_v7, %v368_v3  ;;  %v299_v9 = vrot.slane %v281_v7, %v298_v4  ;;  %v373_v10 = vrot.slane %v281_v7, %v372_v5  ;;  %v303_v11 = vrot.slane %v281_v7, %v302_v6 }
  0x51   : > { %v379_v12 = vrot.slane %v369_v8, %v368_v3  ;;  %v309_v13 = vrot.slane %v299_v9, %v298_v4  ;;  %v383_v14 = vrot.slane %v373_v10, %v368_v3  ;;  %v313_v15 = vrot.slane %v303_v11, %v298_v4 }
  0x53   : > { %529 = vrot.lane.b32.xlu0 %v379_v12, %s1240_s27  ;;  %481 = vrot.lane.b32.xlu1 %v309_v13, %s1241_s29 }
  0x57   : > { %531 = vrot.lane.b32.xlu0 %v383_v14, %s1240_s27  ;;  %483 = vrot.lane.b32.xlu1 %v313_v15, %s1241_s29 }
  0x5b   : > { %452 = vrot.lane.b32.xlu0 %v379_v12, %s1242_s7  ;;  %454 = vrot.lane.b32.xlu1 %v383_v14, %s1242_s7 }
  0x5f   : > { %417 = vrot.lane.b32.xlu0 %v309_v13, %s1243_s10  ;;  %419 = vrot.lane.b32.xlu1 %v313_v15, %s1243_s10 }
  0x63   : > { %386 = vrot.lane.b32.xlu0 %v379_v12, %s1244_s11  ;;  %388 = vrot.lane.b32.xlu1 %v383_v14, %s1244_s11 }
  0x67   : > { %316 = vrot.lane.b32.xlu0 %v309_v13, %s1245_s12  ;;  %318 = vrot.lane.b32.xlu1 %v313_v15, %s1245_s12 }
  0x6b   : > { %515 = vrot.lane.b32.xlu1 %v1435_v16, %s1246_s20  ;;  %517 = vrot.lane.b32.xlu0 %v1239_v1, %s1246_s20 }
  0x6f   : > { %513 = vrot.lane.b32.xlu1 %v1442_v17, %s1246_s20  ;;  %352 = vrot.lane.b32.xlu0 %v1442_v17, %s1248_s26 }
  0x73   : > { %354 = vrot.lane.b32.xlu1 %v1435_v16, %s1248_s26 }
  0xc5   : > { %v1450_v19 = vpop.permute.xlu0 %529  ;;  %v1452_v20 = vpop.permute.xlu1 %481 }
  0xc6   : > { %v537_v21 = vmul.f32 %v1450_v19, %v1442_v17  ;;  %v489_v24 = vmul.f32 %v1452_v20, %v1442_v17 }
  0xc8   : > { %543 = vrot.lane.b32.xlu0 %v537_v21, %s1245_s12 }
  0xc9   : > { %v532_v22 = vpop.permute.xlu0 %531  ;;  %v484_v23 = vpop.permute.xlu1 %483 }
  0xca   : > { %v539_v25 = vmul.f32 0.0, %v532_v22  ;;  %v491_v28 = vmul.f32 0.0, %v484_v23  ;;  %v1479_v37 = vsel %vm337_vm0, %v1450_v19, %v532_v22  ;;  %v1487_v41 = vsel %vm407_vm1, %v1452_v20, %v484_v23 }
  0xcb   : > { %v538_v40 = vmul.f32 %v1479_v37, %v1435_v16  ;;  %v490_v43 = vmul.f32 %v1487_v41, %v1435_v16 }
  0xcc   : > { %547 = vrot.lane.b32.xlu1 %v539_v25, %s1245_s12  ;;  %495 = vrot.lane.b32.xlu0 %v489_v24, %s1244_s11 }
  0xcd   : > { %v1461_v26 = vpop.permute.xlu0 %452  ;;  %v455_v27 = vpop.permute.xlu1 %454 }
  0xce   : > { %v462_v29 = vmul.f32 0.0, %v455_v27  ;;  %v460_v32 = vmul.f32 %v1461_v26, %v1442_v17  ;;  %v1491_v42 = vsel %vm438_vm2, %v1461_v26, %v455_v27 }
  0xcf   : > { %v461_v44 = vmul.f32 %v1491_v42, %v1435_v16 }
  0xd0   : > { %499 = vrot.lane.b32.xlu1 %v491_v28, %s1244_s11  ;;  %470 = vrot.lane.b32.xlu0 %v462_v29, %s1243_s10 }
  0xd1   : > { %v418_v30 = vpop.permute.xlu0 %417  ;;  %v1465_v31 = vpop.permute.xlu1 %419 }
  0xd2   : > { %v426_v33 = vmul.f32 0.0, %v418_v30  ;;  %v428_v35 = vmul.f32 %v1465_v31, %v1435_v16  ;;  %v1503_v47 = vsel %vm421_vm3, %v418_v30, %v1465_v31 }
  0xd3   : > { %v427_v50 = vmul.f32 %v1503_v47, %v1442_v17 }
  0xd4   : > { %466 = vrot.lane.b32.xlu1 %v460_v32, %s1243_s10  ;;  %432 = vrot.lane.b32.xlu0 %v426_v33, %s1242_s7 }
  0xd5   : > { %v1471_v34 = vpop.permute.xlu1 %388  ;;  %v387_v38 = vpop.permute.xlu0 %386 }
  0xd6   : > { %v397_v36 = vmul.f32 %v1471_v34, %v1435_v16  ;;  %v395_v39 = vmul.f32 0.0, %v387_v38  ;;  %v1507_v48 = vsel %vm390_vm4, %v387_v38, %v1471_v34 }
  0xd7   : > { %v396_v51 = vmul.f32 %v1507_v48, %v1442_v17 }
  0xd8   : > { %436 = vrot.lane.b32.xlu1 %v428_v35, %s1242_s7  ;;  %405 = vrot.lane.b32.xlu0 %v397_v36, %s1241_s29 }
  0xd9   : > { %v317_v45 = vpop.permute.xlu0 %316  ;;  %v1499_v46 = vpop.permute.xlu1 %318 }
  0xda   : > { %v1513_v49 = vsel %vm320_vm5, %v317_v45, %v1499_v46  ;;  %v1526_v53 = vmul.f32 0.0, %v317_v45  ;;  %v327_v54 = vmul.f32 %v1499_v46, %v1435_v16 }
  0xdb   : > { %v326_v52 = vmul.f32 %v1513_v49, %v1442_v17 }
  0xdc   : > { %401 = vrot.lane.b32.xlu1 %v395_v39, %s1241_s29  ;;  %545 = vrot.lane.b32.xlu0 %v538_v40, %s1245_s12 }
  0xdd   : > { %v516_v56 = vpop.permute.xlu1 %515  ;;  %v518_v57 = vpop.permute.xlu0 %517 }
  0xde   : > { %v521_v11 = vsel %vm519_vm6, %v516_v56, %v518_v57 }
  0xe0   : > { %468 = vrot.lane.b32.xlu1 %v461_v44, %s1243_s10  ;;  %497 = vrot.lane.b32.xlu0 %v490_v43, %s1244_s11 }
  0xe1   : > { %v514_v58 = vpop.permute.xlu1 %513  ;;  %v353_v59 = vpop.permute.xlu0 %352 }
  0xe2   : > { %v520_v14 = vsel %vm519_vm6, %v514_v58, %v516_v56 }
  0xe4   : > { %434 = vrot.lane.b32.xlu0 %v427_v50, %s1242_s7  ;;  %403 = vrot.lane.b32.xlu1 %v396_v51, %s1241_s29 }
  0xe5   : > { %v355_v60 = vpop.permute.xlu1 %354 }
  0xe8   : > { %350 = vrot.lane.b32.xlu0 %v1239_v1, %s1248_s26  ;;  %333 = vrot.lane.b32.xlu1 %v326_v52, %s1240_s27 }
  0xec   : > { %335 = vrot.lane.b32.xlu0 %v327_v54, %s1240_s27  ;;  %331 = vrot.lane.b32.xlu1 %v1526_v53, %s1240_s27 }
  0xf0   : > { %575 = vperm.xlu0 %1112, %v285_v55   ;;  %821 = vrot.lane.b32.xlu1 %v539_v25, %s1245_s12 }
  0xf4   : > { %800 = vrot.lane.b32.xlu0 %v1239_v1, %s1246_s20  ;;  %782 = vrot.lane.b32.xlu1 %v491_v28, %s1244_s11 }
  0xf8   : > { %761 = vrot.lane.b32.xlu0 %v462_v29, %s1243_s10  ;;  %711 = vrot.lane.b32.xlu1 %v395_v39, %s1241_s29  ;;  %v284_v39 = vld [vmem:[%s1681_s2] sm:$0xff] }
  0xfc   : > { %732 = vrot.lane.b32.xlu0 %v426_v33, %s1242_s7  ;;  %v358_v33 = vsel %vm356_vm7, %v353_v59, %v355_v60 }
 0x13a   : > { %v544_v61 = vpop.permute.xlu0 %543 }
 0x13e   : > { %v496_v62 = vpop.permute.xlu0 %495  ;;  %v548_v63 = vpop.permute.xlu1 %547 }
 0x142   : > { %v471_v0 = vpop.permute.xlu0 %470  ;;  %v500_v2 = vpop.permute.xlu1 %499 }
 0x146   : > { %v433_v3 = vpop.permute.xlu0 %432  ;;  %v467_v4 = vpop.permute.xlu1 %466 }
 0x14a   : > { %v406_v5 = vpop.permute.xlu0 %405  ;;  %v437_v6 = vpop.permute.xlu1 %436 }
 0x14e   : > { %v546_v7 = vpop.permute.xlu0 %545  ;;  %v402_v8 = vpop.permute.xlu1 %401 }
 0x14f   : > { %v550_v9 = vsel %vm320_vm5, %v546_v7, %v548_v63  ;;  %v549_v10 = vsel %vm320_vm5, %v544_v61, %v546_v7 }
 0x150   : > { %596 = vmatprep.subr.mxu0 %v550_v9 }
 0x151   : > { %597 = vmatpush1.msra.mxu0 %v549_v10 }
 0x152   : > { %v498_v12 = vpop.permute.xlu0 %497  ;;  %598 = vmatprep.subr.mxu0 %v521_v11  ;;  %v469_v13 = vpop.permute.xlu1 %468 }
 0x153   : > { %599 = vmatpush1.msra.mxu0 %v520_v14  ;;  %v502_v15 = vsel %vm390_vm4, %v498_v12, %v500_v2  ;;  %v501_v18 = vsel %vm390_vm4, %v496_v62, %v498_v12  ;;  %v473_v21 = vsel %vm421_vm3, %v469_v13, %v471_v0  ;;  %v472_v24 = vsel %vm421_vm3, %v467_v4, %v469_v13 }
 0x154   : > { %600 = vmatprep.subr.mxu0 %v502_v15 }
 0x155   : > { %601 = vmatpush1.msra.mxu0 %v501_v18 }
 0x156   : > { %v435_v22 = vpop.permute.xlu0 %434  ;;  %602 = vmatprep.subr.mxu0 %v473_v21  ;;  %v404_v23 = vpop.permute.xlu1 %403 }
 0x157   : > { %603 = vmatpush1.msra.mxu0 %v472_v24  ;;  %v440_v25 = vsel %vm438_vm2, %v435_v22, %v437_v6  ;;  %v439_v29 = vsel %vm438_vm2, %v433_v3, %v435_v22  ;;  %v409_v30 = vsel %vm407_vm1, %v404_v23, %v406_v5  ;;  %v408_v32 = vsel %vm407_vm1, %v402_v8, %v404_v23 }
 0x158   : > { %604 = vmatprep.subr.mxu0 %v1435_v16 }
 0x159   : > { %605 = vmatpush1.msra.mxu0 %v1442_v17 }
 0x15a   : > { %v351_v27 = vpop.permute.xlu0 %350  ;;  %606 = vmatprep.subr.mxu0 %v440_v25  ;;  %v334_v28 = vpop.permute.xlu1 %333 }
 0x15b   : > { %607 = vmatpush1.msra.mxu0 %v439_v29  ;;  %v357_v35 = vsel %vm356_vm7, %v351_v27, %v353_v59 }
 0x15c   : > { %608 = vmatprep.subr.mxu0 %v409_v30 }
 0x15d   : > { %609 = vmatpush1.msra.mxu0 %v408_v32 }
 0x15e   : > { %v336_v16 = vpop.permute.xlu0 %335  ;;  %610 = vmatprep.subr.mxu0 %v358_v33  ;;  %v332_v17 = vpop.permute.xlu1 %331 }
 0x15f   : > { %611 = vmatpush1.msra.mxu0 %v357_v35  ;;  %v339_v36 = vsel %vm337_vm0, %v334_v28, %v336_v16  ;;  %v338_v38 = vsel %vm337_vm0, %v332_v17, %v334_v28  ;;  %v655_v17 = vld [vmem:[%s1683_s4] sm:$0xff] }
 0x160   : > { %612 = vmatprep.subr.mxu0 %v339_v36 }
 0x161   : > { %613 = vmatpush1.msra.mxu0 %v338_v38 }
 0x162   : > { %1036 = vmatmul.mubr.msk.f32.vlgmr.msra.gmra.mxu0 %vm578_vm8, %v284_v39 }
 0x16b   : > { %v576_v40 = vpop.permute.xlu0 %575 }
 0x222   : > { %v648_v43 = vpop.f32.mrf.mxu0 }
 0x223   : > { %v649_v44 = vadd.f32 %v648_v43, %v576_v40 }
 0x224   : > { %v650_v45 = vpop.f32.mrf.mxu0 }
 0x225   : > { %v1565_v50 = vmax.f32 %v649_v44, 0.0  ;;  %v651_v51 = vadd.f32 %v650_v45, %v576_v40 }
 0x227   : > { %692 = vrot.lane.b32.xlu0 %v1565_v50, %s1248_s26  ;;  %796 = vrot.lane.b32.xlu1 %v1565_v50, %s1246_s20  ;;  %v1571_v52 = vmax.f32 %v651_v51, 0.0  ;;  %v811_v54 = vmul.f32 %v1565_v50, %v1450_v19  ;;  %v772_v55 = vmul.f32 %v1565_v50, %v1452_v20  ;;  %v751_v56 = vmul.f32 %v1565_v50, %v1461_v26 }
 0x228   : > { %v727_v57 = vmul.f32 %v1565_v50, %v1503_v47  ;;  %v706_v19 = vmul.f32 %v1565_v50, %v1507_v48 }
 0x229   : > { %v773_v20 = vmul.f32 %v1571_v52, %v1487_v41  ;;  %v812_v26 = vmul.f32 %v1571_v52, %v1479_v37  ;;  %v707_v47 = vmul.f32 %v1571_v52, %v1471_v34  ;;  %v752_v48 = vmul.f32 %v1571_v52, %v1491_v42  ;;  %v822_v42 = vpop.permute.xlu1 %821 }
 0x22a   : > { %v668_v37 = vmul.f32 %v1571_v52, %v1499_v46  ;;  %v728_v41 = vmul.f32 %v1571_v52, %v1465_v31  ;;  %v667_v34 = vmul.f32 %v1565_v50, %v1513_v49  ;;  %v801_v46 = vpop.permute.xlu0 %800 }
 0x22b   : > { %798 = vrot.lane.b32.xlu1 %v1571_v52, %s1246_s20  ;;  %817 = vrot.lane.b32.xlu0 %v811_v54, %s1245_s12 }
 0x22d   : > { %v783_v31 = vpop.permute.xlu1 %782 }
 0x22e   : > { %v762_v58 = vpop.permute.xlu0 %761 }
 0x22f   : > { %778 = vrot.lane.b32.xlu0 %v772_v55, %s1244_s11  ;;  %757 = vrot.lane.b32.xlu1 %v751_v56, %s1243_s10 }
 0x231   : > { %v712_v59 = vpop.permute.xlu1 %711 }
 0x232   : > { %v733_v60 = vpop.permute.xlu0 %732 }
 0x233   : > { %734 = vrot.lane.b32.xlu0 %v727_v57, %s1242_s7  ;;  %713 = vrot.lane.b32.xlu1 %v706_v19, %s1241_s29 }
 0x237   : > { %780 = vrot.lane.b32.xlu0 %v773_v20, %s1244_s11  ;;  %819 = vrot.lane.b32.xlu1 %v812_v26, %s1245_s12 }
 0x23b   : > { %690 = vrot.lane.b32.xlu0 %v1239_v1, %s1248_s26  ;;  %694 = vrot.lane.b32.xlu1 %v1571_v52, %s1248_s26  ;;  %v656_v1 = vld [vmem:[%s1684_s5] sm:$0xff] }
 0x23f   : > { %715 = vrot.lane.b32.xlu0 %v707_v47, %s1241_s29  ;;  %759 = vrot.lane.b32.xlu1 %v752_v48, %s1243_s10  ;;  %s280_s10 = scalar_lea.vmem [#allocation10], %s1033_s14 }
 0x240   : > { %s945_s11 = sshll.u32 %s280_s10, 4  ;;  %s946_s11 = int_to_ptr.vmem [resolvable:$true] %s945_s11 }
 0x241   : > { %s1167_s30 = scalar_lea.vmem %s946_s11, 256 }
 0x242   : > { %p1168_p9 = scmp.ne.s32.totalorder %s946_s11, %s1167_s30 }
 0x243   : > { %676 = vrot.lane.b32.xlu0 %v668_v37, %s1240_s27  ;;  %736 = vrot.lane.b32.xlu1 %v728_v41, %s1242_s7  ;;  %s1044_s7 = sshll.u32 %s1306_s25, 8  ;;  %s1249_s25 = smov [#allocation10]  }
 0x244   : > { %s943_s26 = scalar_lea.hbm %s1685_s6, %s1044_s7  ;;  %p1169_p13 = pnand %p1168_p9, %p1704_p11 }
 0x245   : > { %s1171_s18 = sshll.u32 %s1249_s25, 4  ;;  %s1172_s18 = int_to_ptr.vmem [resolvable:$false] %s1171_s18 }
 0x246   : > { %p1170_p10 = pneg %p1169_p13  ;;  %s1173_s14 = scalar_lea.vmem %s1172_s18, 512 }
 0x247   : > { %849 = vperm.xlu0 %1112, %v656_v1   ;;  %674 = vrot.lane.b32.xlu1 %v667_v34, %s1240_s27  ;;  %p1174_p1 = scmp.lt.s32.totalorder %s946_s11, %s1172_s18  ;;  %p1175_p2 = scmp.lt.s32.totalorder %s1173_s14, %s1167_s30 }
 0x249   : > { %p1176_p0 = por %p1175_p2, %p1174_p1 }
 0x24b   : > { %672 = vrot.lane.b32.xlu1 %v1526_v53, %s1240_s27  ;;  %p1177_p3 = pnand %p1176_p0, %p1170_p10 }
 0x299   : > { %v693_v61 = vpop.permute.xlu0 %692  ;;  %v797_v62 = vpop.permute.xlu1 %796 }
 0x29d   : > { %v818_v63 = vpop.permute.xlu0 %817  ;;  %v799_v0 = vpop.permute.xlu1 %798 }
 0x29e   : > { %v803_v8 = vsel %vm519_vm6, %v799_v0, %v801_v46  ;;  %v802_v10 = vsel %vm519_vm6, %v797_v62, %v799_v0 }
 0x2a1   : > { %v779_v2 = vpop.permute.xlu0 %778  ;;  %v758_v3 = vpop.permute.xlu1 %757 }
 0x2a5   : > { %v735_v4 = vpop.permute.xlu0 %734  ;;  %v714_v49 = vpop.permute.xlu1 %713 }
 0x2a6   : > { %v738_v24 = vsel %vm438_vm2, %v733_v60, %v735_v4  ;;  %v717_v28 = vsel %vm407_vm1, %v712_v59, %v714_v49 }
 0x2a9   : > { %v781_v5 = vpop.permute.xlu0 %780  ;;  %v820_v6 = vpop.permute.xlu1 %819 }
 0x2aa   : > { %v824_v7 = vsel %vm320_vm5, %v820_v6, %v822_v42  ;;  %v823_v53 = vsel %vm320_vm5, %v818_v63, %v820_v6  ;;  %v785_v11 = vsel %vm390_vm4, %v781_v5, %v783_v31  ;;  %v784_v13 = vsel %vm390_vm4, %v779_v2, %v781_v5 }
 0x2ab   : > { %869 = vmatprep.subr.mxu1 %v824_v7 }
 0x2ac   : > { %870 = vmatpush1.msra.mxu1 %v823_v53 }
 0x2ad   : > { %871 = vmatprep.subr.mxu1 %v803_v8  ;;  %v695_v9 = vpop.permute.xlu1 %694  ;;  %v691_v12 = vpop.permute.xlu0 %690 }
 0x2ae   : > { %872 = vmatpush1.msra.mxu1 %v802_v10  ;;  %v697_v29 = vsel %vm356_vm7, %v693_v61, %v695_v9  ;;  %v696_v32 = vsel %vm356_vm7, %v691_v12, %v693_v61 }
 0x2af   : > { %873 = vmatprep.subr.mxu1 %v785_v11 }
 0x2b0   : > { %874 = vmatpush1.msra.mxu1 %v784_v13 }
 0x2b1   : > { %v760_v14 = vpop.permute.xlu1 %759  ;;  %v716_v21 = vpop.permute.xlu0 %715 }
 0x2b2   : > { %v764_v15 = vsel %vm421_vm3, %v760_v14, %v762_v58  ;;  %v763_v18 = vsel %vm421_vm3, %v758_v3, %v760_v14  ;;  %v718_v25 = vsel %vm407_vm1, %v714_v49, %v716_v21 }
 0x2b3   : > { %875 = vmatprep.subr.mxu1 %v764_v15 }
 0x2b4   : > { %876 = vmatpush1.msra.mxu1 %v763_v18 }
 0x2b5   : > { %877 = vmatprep.subr.mxu1 %v1571_v52  ;;  %v737_v22 = vpop.permute.xlu1 %736  ;;  %v677_v30 = vpop.permute.xlu0 %676 }
 0x2b6   : > { %878 = vmatpush1.msra.mxu1 %v1565_v50  ;;  %v739_v23 = vsel %vm438_vm2, %v735_v4, %v737_v22 }
 0x2b7   : > { %879 = vmatprep.subr.mxu1 %v739_v23 }
 0x2b8   : > { %880 = vmatpush1.msra.mxu1 %v738_v24 }
 0x2b9   : > { %881 = vmatprep.subr.mxu1 %v718_v25  ;;  %v675_v27 = vpop.permute.xlu1 %674 }
 0x2ba   : > { %882 = vmatpush1.msra.mxu1 %v717_v28  ;;  %v679_v33 = vsel %vm337_vm0, %v675_v27, %v677_v30 }
 0x2bb   : > { %883 = vmatprep.subr.mxu1 %v697_v29 }
 0x2bc   : > { %884 = vmatpush1.msra.mxu1 %v696_v32 }
 0x2bd   : > { %885 = vmatprep.subr.mxu1 %v679_v33  ;;  %v673_v16 = vpop.permute.xlu1 %672 }
 0x2be   : > { %v678_v35 = vsel %vm337_vm0, %v673_v16, %v675_v27 }
 0x2bf   : > { %886 = vmatpush1.msra.mxu1 %v678_v35 }
 0x2c0   : > { %1037 = vmatmul.mubr.msk.f32.vlgmr.msra.gmra.mxu1 %vm578_vm8, %v655_v17 }
 0x2c2   : > { %v850_v36 = vpop.permute.xlu0 %849 }
 0x380   : > { %v921_v38 = vpop.f32.mrf.mxu1 }
 0x381   : > { %v922_v39 = vadd.f32 %v921_v38, %v850_v36 }
 0x382   : > { %v923_v40 = vpop.f32.mrf.mxu1 }
 0x383   : > { %v926_v43 = vmax.f32 %v922_v39, 0.0  ;;  %v924_v44 = vadd.f32 %v923_v40, %v850_v36 }
 0x385   : > { %928 = vst [vmem:[%s280_s10] sm:$0xff] %v926_v43  ;;  %v927_v45 = vmax.f32 %v924_v44, 0.0 }
 0x387   : > { %929 = vst [vmem:[%s280_s10 + $0x8] sm:$0xff] %v927_v45 }
 0x388   : > { %1180 = shalt.err (!%p1177_p3)
}
 0x389   : > { %s1181_s9 = scalar_lea.hbm %s943_s26, 256  ;;  %s1185_s1 = scalar_lea.hbm %s1685_s6, 512 }
 0x38a   : > { %p1182_p12 = scmp.ne.s32.totalorder %s943_s26, %s1181_s9  ;;  %p1186_p4 = scmp.lt.s32.totalorder %s943_s26, %s1685_s6 }
 0x38b   : > { %p1187_p6 = scmp.lt.s32.totalorder %s1185_s1, %s1181_s9 }
 0x38c   : > { %p1183_p5 = pnand %p1182_p12, %p1704_p11 }
 0x38d   : > { %p1188_p8 = por %p1187_p6, %p1186_p4 }
 0x38e   : > { %p1184_p7 = pneg %p1183_p5 }
 0x390   : > { %p1189_p9 = pnand %p1188_p8, %p1184_p7 }
 0x392   : > { %1192 = shalt.err (!%p1189_p9)
}
 0x393   : > { %1051 = dma.vmem_to_hbm [thread:$0]  (%p1704_p11), %s946_s11, 256, %s943_s26, %s931_s19  }
 0x394 PF: > { %s957_s7 = sand.u32 1, %s1223_s21   ;;  %p1705_p13 = scmp.ne.s32.totalorder %s1692_s28, 0 }
 0x395   : > { %p1706_p10 = scmp.ge.s32.totalorder %s1235_s24, 2  ;;  %s958_s10 = scalar_lea.sflag [#allocation7], %s957_s7 }
 0x397   : > { %p1062_p1 = pnand %p1706_p10, %p1705_p13 }
 0x399   : > { %p1063_p2 = pneg %p1062_p1 }
 0x39b   : > { %1218 = dma.done.wait (%p1063_p2), %s958_s10, 256  }
 0x39c   : > { %1220 = vsyncadd (%p1063_p2), %s958_s10, 4294967040  ;;  %p20_p0 = scmp.ge.s32.totalorder %s1333_s8, 4   ;;  %s1707_s21 = smov %s1227_s22 }
 0x39d   : > { %s1708_s22 = smov %s1231_s23  ;;  %s1709_s23 = smov %s1360_s16 }
 0x39e   : > { %s1710_s24 = smov %s1333_s8  ;;  %22 = sbr.rel (!%p20_p0) target bundleno = 8 (0x8), region = 93 }
 0x3a3   :  { %963 = vsyncpa [#allocation6], 1 }
 0x3a4   :  { %965 = vsyncpa [#allocation6 + $0x1], 1 }
 0x3a5   :  { %966 = vsyncpa [#allocation9], 1 }
 0x3a6   :  { %967 = vsyncpa [#allocation7], 1 }
 0x3a7   :  { %969 = vsyncpa [#allocation7 + $0x1], 1 }

</bundles_post_ra>
